<compile_context>
chip_gen: v7x
topology: tpu7x:2x2x1
jax: 0.10.0
libtpu: 0.0.40
codegen_flags: <defaults>
</compile_context>

<pallas_src>
import jax
import jax.numpy as jnp
from jax.experimental import pallas as pl
from jax.experimental.pallas import tpu as pltpu

_LANE = 128
_NCORES = 2                    # leading "parallel" grid axis (v7x has 2 TCs)
_TARGET_TILE_BYTES = 4 << 20   # ~4 MiB per input buffer per grid step
_VMEM_LIMIT_BYTES = 32 << 20   # 2 inputs x 2 buffers x 4 MiB = 16 MiB + slack


def _sublane_multiple(dtype):
    # f32 -> 8, bf16/f16 -> 16, int8/fp8 -> 32 (sub-32-bit packs along sublanes)
    return max(8, 32 // jnp.dtype(dtype).itemsize)


def _round_up(x, m):
    return ((x + m - 1) // m) * m


def _make_elbo_kernel(tile_rows, steps, total_blocks, valid_rows):
    fold_groups = tile_rows // 8

    def kernel(x_ref, t_ref, out_ref):
        c = pl.program_id(0)
        i = pl.program_id(1)
        blk = c * steps + i            # logical row-block index (DMA is clamped)

        @pl.when(i == 0)
        def _():
            out_ref[...] = jnp.zeros_like(out_ref)

        d = x_ref[...].astype(jnp.float32) - t_ref[...].astype(jnp.float32)
        dd = d * d

        # Steady state: fully valid block, no masking (minimal VPU work).
        @pl.when(blk < total_blocks - 1)
        def _():
            out_ref[...] += dd.reshape(fold_groups, 8, _LANE).sum(axis=0)

        # Last (possibly partial) block, or a clamped-duplicate block on the
        # core that ran out of real blocks: row-only mask.  Lane tail padding
        # is already zero-filled by the wrapper, so it needs no masking.
        @pl.when(blk >= total_blocks - 1)
        def _():
            row_ids = (jax.lax.broadcasted_iota(jnp.int32, dd.shape, 0)
                       + blk * tile_rows)
            masked = jnp.where(row_ids < valid_rows, dd, 0.0)
            out_ref[...] += masked.reshape(fold_groups, 8, _LANE).sum(axis=0)

    return kernel


@jax.jit
def elbo_forward(inp, target, kl, kl_weight=1.0):
    """Returns (total_loss, likelihood_cost, complexity_cost) as f32 scalars."""
    target = jax.lax.stop_gradient(target)   # mirrors `assert not target.requires_grad`
    x = inp.reshape(-1)
    t = target.reshape(-1)
    n = x.shape[0]

    # Lane-align: pad (zero-fill) up to a multiple of 128; padded entries
    # contribute (0-0)^2 = 0, so no lane-level mask is needed in the kernel.
    pad = (-n) % _LANE
    if pad:
        x = jnp.pad(x, (0, pad))
        t = jnp.pad(t, (0, pad))
    rows = (n + pad) // _LANE

    x2 = x.reshape(rows, _LANE)
    t2 = t.reshape(rows, _LANE)

    # Dtype-aware tile: sublane multiple per packing, ~4 MiB per input buffer.
    sub = max(_sublane_multiple(x2.dtype), _sublane_multiple(t2.dtype))
    max_itemsize = max(x2.dtype.itemsize, t2.dtype.itemsize)
    tile_cap = max(sub, (_TARGET_TILE_BYTES // (_LANE * max_itemsize)) // sub * sub)
    tile_rows = max(sub, min(tile_cap, _round_up(rows, sub)))

    total_blocks = pl.cdiv(rows, tile_rows)
    steps = pl.cdiv(total_blocks, _NCORES)
    grid = (_NCORES, steps)

    def in_index_map(c, i):
        # Clamp so the DMA'd block always lies inside the array; logically
        # out-of-range blocks are fully masked inside the kernel.
        return (jnp.minimum(c * steps + i, total_blocks - 1), 0)

    kernel = _make_elbo_kernel(tile_rows, steps, total_blocks, rows)

    bytes_accessed = rows * _LANE * (x2.dtype.itemsize + t2.dtype.itemsize)

    partials = pl.pallas_call(
        kernel,
        out_shape=jax.ShapeDtypeStruct((_NCORES * 8, _LANE), jnp.float32),
        grid_spec=pltpu.PrefetchScalarGridSpec(
            num_scalar_prefetch=0,
            grid=grid,
            in_specs=[
                pl.BlockSpec((tile_rows, _LANE), in_index_map),
                pl.BlockSpec((tile_rows, _LANE), in_index_map),
            ],
            out_specs=pl.BlockSpec((8, _LANE), lambda c, i: (c, 0)),
        ),
        compiler_params=pltpu.CompilerParams(
            dimension_semantics=("parallel", "arbitrary"),
            vmem_limit_bytes=_VMEM_LIMIT_BYTES),
        cost_estimate=pl.CostEstimate(
            flops=3 * n, transcendentals=0, bytes_accessed=int(bytes_accessed)),
    )(x2, t2)

    # Tiny scalar epilogue in the wrapper (one vreg-array sum + scalar math).
    likelihood = jnp.sum(partials) * jnp.float32(1.0 / n)
    complexity = jnp.asarray(kl_weight, jnp.float32) * jnp.asarray(kl, jnp.float32)
    total = likelihood + complexity
    return total, likelihood, complexity


if __name__ == "__main__":
    key = jax.random.PRNGKey(0)
    k1, k2, k3 = jax.random.split(key, 3)

    # small shapes consistent with the module's use (NCHW conv-style outputs)
    x = jax.random.normal(k1, (2, 4, 16, 16), dtype=jnp.float32)      # "input"
    y = jax.random.normal(k2, (2, 4, 16, 16), dtype=jnp.float32)      # "target"
    kl = jnp.abs(jax.random.normal(k3, (), dtype=jnp.float32))        # KL term
    kl_weight = 0.5

    # --- f32 path ---
    total, lik, comp = elbo_forward(x, y, kl, kl_weight)
    jax.block_until_ready((total, lik, comp))

    ref_lik = jnp.mean((x - y) ** 2)
    ref_comp = kl_weight * kl
    ref_total = ref_lik + ref_comp
    assert jnp.allclose(lik, ref_lik, rtol=1e-5, atol=1e-6)
    assert jnp.allclose(comp, ref_comp, rtol=1e-5, atol=1e-6)
    assert jnp.allclose(total, ref_total, rtol=1e-5, atol=1e-6)

    # --- bf16 path (kernel streams bf16, accumulates f32) ---
    xb = x.astype(jnp.bfloat16)
    yb = y.astype(jnp.bfloat16)
    total_b, lik_b, comp_b = elbo_forward(xb, yb, kl, kl_weight)
    jax.block_until_ready((total_b, lik_b, comp_b))
    ref_lik_b = jnp.mean((xb.astype(jnp.float32) - yb.astype(jnp.float32)) ** 2)
    assert jnp.allclose(lik_b, ref_lik_b, rtol=1e-4, atol=1e-6)
    assert jnp.allclose(total_b, ref_lik_b + ref_comp, rtol=1e-4, atol=1e-6)

    # --- odd element count (exercises lane pad + partial last block mask) ---
    k4, k5 = jax.random.split(k3)
    xo = jax.random.normal(k4, (3, 5, 14), dtype=jnp.float32)   # 210 elements
    yo = jax.random.normal(k5, (3, 5, 14), dtype=jnp.float32)
    total_o, lik_o, comp_o = elbo_forward(xo, yo, kl, kl_weight)
    jax.block_until_ready((total_o, lik_o, comp_o))
    ref_lik_o = jnp.mean((xo - yo) ** 2)
    assert jnp.allclose(lik_o, ref_lik_o, rtol=1e-5, atol=1e-6)
    assert jnp.allclose(total_o, ref_lik_o + ref_comp, rtol=1e-5, atol=1e-6)

    print("KERNEL_OK")
</pallas_src>

<mosaic_0001>
module attributes {stable_mosaic.version = 11 : i64} {
  func.func @kernel(%arg0: i32, %arg1: i32, %arg2: memref<16x128xf32, #tpu.memory_space<vmem>>, %arg3: memref<16x128xf32, #tpu.memory_space<vmem>>, %arg4: memref<8x128xf32, #tpu.memory_space<vmem>>) attributes {dimension_semantics = [#tpu.dimension_semantics<parallel>, #tpu.dimension_semantics<arbitrary>], iteration_bounds = array<i64: 2, 1>, scalar_prefetch = 0 : i64, scratch_operands = 0 : i64, tpu.core_type = #tpu.core_type<tc>, window_params = [{transform_indices = @transform_0, window_bounds = array<i64: 16, 128>}, {transform_indices = @transform_1, window_bounds = array<i64: 16, 128>}, {transform_indices = @transform_2, window_bounds = array<i64: 8, 128>}]} {
    %c1_i32 = arith.constant 1 : i32
    %0 = arith.muli %arg0, %c1_i32 : i32
    %1 = arith.addi %0, %arg1 : i32
    %c0_i32 = arith.constant 0 : i32
    %2 = arith.cmpi eq, %arg1, %c0_i32 : i32
    %3 = arith.extui %2 : i1 to i32
    %c0_i32_0 = arith.constant 0 : i32
    %4 = arith.cmpi ne, %3, %c0_i32_0 : i32
    scf.if %4 {
      %cst = arith.constant 0.000000e+00 : f32
      %15 = vector.broadcast %cst : f32 to vector<8x128xf32>
      %c0_8 = arith.constant 0 : index
      %c0_9 = arith.constant 0 : index
      %16 = vector.load %arg4[%c0_8, %c0_9] : memref<8x128xf32, #tpu.memory_space<vmem>>, vector<8x128xf32>
      tpu.vector_store %arg4[%c0_8, %c0_9], %15 {strides = array<i32>} : memref<8x128xf32, #tpu.memory_space<vmem>>, vector<8x128xf32>,
    } else {
    }
    %c0 = arith.constant 0 : index
    %c0_1 = arith.constant 0 : index
    %5 = vector.load %arg2[%c0, %c0_1] : memref<16x128xf32, #tpu.memory_space<vmem>>, vector<16x128xf32>
    %c0_2 = arith.constant 0 : index
    %c0_3 = arith.constant 0 : index
    %6 = vector.load %arg3[%c0_2, %c0_3] : memref<16x128xf32, #tpu.memory_space<vmem>>, vector<16x128xf32>
    %7 = arith.subf %5, %6 : vector<16x128xf32>
    %8 = arith.mulf %7, %7 : vector<16x128xf32>
    %c0_i32_4 = arith.constant 0 : i32
    %9 = arith.cmpi slt, %1, %c0_i32_4 : i32
    %10 = arith.extui %9 : i1 to i32
    %c0_i32_5 = arith.constant 0 : i32
    %11 = arith.cmpi ne, %10, %c0_i32_5 : i32
    scf.if %11 {
      %c0_8 = arith.constant 0 : index
      %c0_9 = arith.constant 0 : index
      %15 = vector.load %arg4[%c0_8, %c0_9] : memref<8x128xf32, #tpu.memory_space<vmem>>, vector<8x128xf32>
      %16 = vector.shape_cast %8 : vector<16x128xf32> to vector<2x8x128xf32>
      %cst = arith.constant dense<0.000000e+00> : vector<8x128xf32>
      %17 = vector.multi_reduction <add>, %16, %cst [0] : vector<2x8x128xf32> to vector<8x128xf32>
      %18 = arith.addf %15, %17 : vector<8x128xf32>
      %c0_10 = arith.constant 0 : index
      %c0_11 = arith.constant 0 : index
      %19 = vector.load %arg4[%c0_10, %c0_11] : memref<8x128xf32, #tpu.memory_space<vmem>>, vector<8x128xf32>
      tpu.vector_store %arg4[%c0_10, %c0_11], %18 {strides = array<i32>} : memref<8x128xf32, #tpu.memory_space<vmem>>, vector<8x128xf32>,
    } else {
    }
    %c0_i32_6 = arith.constant 0 : i32
    %12 = arith.cmpi sge, %1, %c0_i32_6 : i32
    %13 = arith.extui %12 : i1 to i32
    %c0_i32_7 = arith.constant 0 : i32
    %14 = arith.cmpi ne, %13, %c0_i32_7 : i32
    scf.if %14 {
      %15 = tpu.iota {dimensions = array<i32: 0>} : vector<16x128xi32>
      %c16_i32 = arith.constant 16 : i32
      %16 = arith.muli %1, %c16_i32 : i32
      %17 = vector.broadcast %16 : i32 to vector<16x128xi32>
      %18 = arith.addi %15, %17 : vector<16x128xi32>
      %c16_i32_8 = arith.constant 16 : i32
      %19 = vector.broadcast %c16_i32_8 : i32 to vector<16x128xi32>
      %20 = arith.cmpi slt, %18, %19 : vector<16x128xi32>
      %cst = arith.constant 0.000000e+00 : f32
      %21 = vector.broadcast %cst : f32 to vector<16x128xf32>
      %22 = arith.select %20, %8, %21 : vector<16x128xi1>, vector<16x128xf32>
      %c0_9 = arith.constant 0 : index
      %c0_10 = arith.constant 0 : index
      %23 = vector.load %arg4[%c0_9, %c0_10] : memref<8x128xf32, #tpu.memory_space<vmem>>, vector<8x128xf32>
      %24 = vector.shape_cast %22 : vector<16x128xf32> to vector<2x8x128xf32>
      %cst_11 = arith.constant dense<0.000000e+00> : vector<8x128xf32>
      %25 = vector.multi_reduction <add>, %24, %cst_11 [0] : vector<2x8x128xf32> to vector<8x128xf32>
      %26 = arith.addf %23, %25 : vector<8x128xf32>
      %c0_12 = arith.constant 0 : index
      %c0_13 = arith.constant 0 : index
      %27 = vector.load %arg4[%c0_12, %c0_13] : memref<8x128xf32, #tpu.memory_space<vmem>>, vector<8x128xf32>
      tpu.vector_store %arg4[%c0_12, %c0_13], %26 {strides = array<i32>} : memref<8x128xf32, #tpu.memory_space<vmem>>, vector<8x128xf32>,
    } else {
    }
    return
  }
  func.func @transform_0(%arg0: i32, %arg1: i32) -> (i32, i32) {
    %c1_i32 = arith.constant 1 : i32
    %0 = arith.muli %arg0, %c1_i32 : i32
    %1 = arith.addi %0, %arg1 : i32
    %c0_i32 = arith.constant 0 : i32
    %2 = arith.minsi %1, %c0_i32 : i32
    %c0_i32_0 = arith.constant 0 : i32
    %c0_i32_1 = arith.constant 0 : i32
    return %2, %c0_i32_0 : i32, i32
  }
  func.func @transform_1(%arg0: i32, %arg1: i32) -> (i32, i32) {
    %c1_i32 = arith.constant 1 : i32
    %0 = arith.muli %arg0, %c1_i32 : i32
    %1 = arith.addi %0, %arg1 : i32
    %c0_i32 = arith.constant 0 : i32
    %2 = arith.minsi %1, %c0_i32 : i32
    %c0_i32_0 = arith.constant 0 : i32
    %c0_i32_1 = arith.constant 0 : i32
    return %2, %c0_i32_0 : i32, i32
  }
  func.func @transform_2(%arg0: i32, %arg1: i32) -> (i32, i32) {
    %c0_i32 = arith.constant 0 : i32
    %c0_i32_0 = arith.constant 0 : i32
    return %arg0, %c0_i32 : i32, i32
  }
}

</mosaic_0001>

<bundles_post_ra>
// kernel: elbo_forward.1
= control target key start
LH: loop header
LB: loop body
LE: loop exit
PB: predicated region body
PF: predicated region fallthrough
CT: control target
= control target key end

     0   :  { %s414_s9 = smov 0   ;;  %s416_s10 = smov 0   ;;  %s469_s0 = inlined_call_operand.vmem [shape: f32[16,128], index: 0, kind: input, shape index: {}]   ;;  %s470_s1 = inlined_call_operand.vmem [shape: f32[16,128], index: 1, kind: input, shape index: {}]   ;;  %s471_s2 = inlined_call_operand.vmem [shape: f32[16,128], index: 2, kind: output, shape index: {}]  }
   0x1   :  { %s418_s11 = smov 0  }
   0x2 LB: > { %s24_s12 = sadd.s32 1, %s392_s10  ;;  %p338_p0 = scmp.ge.s32.totalorder %s396_s11, 1  ;;  %s396_s11 = sphi %s418_s11, %s12_s11   ;;  %s392_s10 = sphi %s416_s10, %s473_s10   ;;  %s388_s9 = sphi %s414_s9, %s472_s9  }
   0x3   : > { %p26_p1 = scmp.ge.s32.totalorder %s24_s12, 2  ;;  %p160_p2 = scmp.lt.s32.totalorder %s396_s11, 3 }
   0x5   : > { %s475_s12 = smov (%p26_p1, %s24_s12), 0  ;;  %p161_p3 = pnand %p338_p0, %p160_p2 }
   0x6   : > { %p193_p4 = scmp.lt.s32.totalorder (!%p161_p3), %s388_s9, 0  ;;  %p216_p5 = scmp.lt.s32.totalorder (!%p161_p3), %s388_s9, 1  ;;  %v398_v0 = vmov (!%p161_p3), 0.0  }
   0x7   : > { %164 = sbr.rel (%p161_p3) target bundleno = 48 (0x30), region = 28  ;;  %p344_p7 = scmp.ge.s32.totalorder (!%p161_p3), %s388_s9, 0 }
   0xe   : > { %s194_s13 = scalar_select %p193_p4, %s388_s9, 0 }
   0xf   : > { %s217_s14 = scalar_select %p216_p5, %s388_s9, 1 }
  0x10   : > { %s339_s15 = sshll.u32 %s194_s13, 1 }
  0x11   : > { %p196_p6 = scmp.lt.s32.totalorder %s339_s15, 1  ;;  %s343_s16 = sshll.u32 %s217_s14, 3 }
  0x12   : > { %s443_s19 = scalar_lea.vmem %s471_s2, %s343_s16 }
  0x13   : > { %s477_s15 = smov (!%p196_p6, %s339_s15), 1  ;;  %225 = vst [vmem:[%s443_s19] sm:$0xff] %v398_v0 }
  0x14   : > { %s340_s20 = sshll.u32 %s477_s15, 3  ;;  %237 = sbr.rel (%p344_p7) target bundleno = 33 (0x21), region = 36 }
  0x15   : > { %s199_s23 = scalar_lea.vmem %s469_s0, %s340_s20  ;;  %s211_s26 = scalar_lea.vmem %s470_s1, %s340_s20 }
  0x16   : > { %v226_v1 = vld [vmem:[%s199_s23] sm:$0xff]  ;;  %v227_v2 = vld [vmem:[%s199_s23 + $0x8] sm:$0xff] }
  0x17   : > { %v228_v3 = vld [vmem:[%s211_s26] sm:$0xff]  ;;  %v229_v4 = vld [vmem:[%s211_s26 + $0x8] sm:$0xff] }
  0x18   : > { %v230_v5 = vsub.f32 %v226_v1, %v228_v3  ;;  %v231_v6 = vsub.f32 %v227_v2, %v229_v4 }
  0x1a   : > { %v232_v7 = vmul.f32 %v230_v5, %v230_v5  ;;  %v233_v8 = vmul.f32 %v231_v6, %v231_v6  ;;  %v238_v9 = vld [vmem:[%s443_s19] sm:$0xff] (!%p344_p7) }
  0x1c   : > { %v239_v10 = vadd.f32 %v233_v8, %v232_v7 }
  0x1e   : > { %v240_v11 = vadd.f32 %v239_v10, %v238_v9 }
  0x20   : > { %241 = vst [vmem:[%s443_s19] sm:$0xff] %v240_v11 }
  0x21 PF: > { %245 = sbr.rel (%p193_p4) target bundleno = 48 (0x30), region = 40  ;;  %v246_v12 = vlaneseq (!%p193_p4)  ;;  %s346_s27 = sshll.u32 (!%p193_p4), %s388_s9, 4 }
  0x22   : > { %v250_v13 = vstv (!%p193_p4), %s346_s27 }
  0x23   : > { %v247_v14 = vshrl.u32 (!%p193_p4), %v246_v12, 7 }
  0x25   : > { %v248_v15 = vadd.s32 (!%p193_p4), 8, %v247_v14  ;;  %v251_v16 = vadd.s32 (!%p193_p4), %v250_v13, %v247_v14 }
  0x27   : > { %v252_v17 = vadd.s32 (!%p193_p4), %v250_v13, %v248_v15  ;;  %vm253_vm0 = vcmp.lt.s32.totalorder (!%p193_p4), %v251_v16, 16  ;;  %v257_v20 = vld [vmem:[%s443_s19] sm:$0xff] (!%p193_p4) }
  0x28   : > { %v255_v18 = vsel %vm253_vm0, %v232_v7, 0.0 }
  0x29   : > { %vm254_vm1 = vcmp.lt.s32.totalorder %v252_v17, 16 }
  0x2a   : > { %v256_v19 = vsel %vm254_vm1, %v233_v8, 0.0 }
  0x2b   : > { %v258_v21 = vadd.f32 %v256_v19, %v255_v18 }
  0x2d   : > { %v259_v22 = vadd.f32 %v258_v21, %v257_v20 }
  0x2f   : > { %260 = vst [vmem:[%s443_s19] sm:$0xff] %v259_v22 }
  0x30 PF: > { %s12_s11 = sadd.s32 1, %s396_s11   ;;  %s472_s9 = smov %s392_s10 }
  0x31   : > { %p9_p8 = scmp.ge.s32.totalorder %s12_s11, 4   ;;  %s473_s10 = smov %s475_s12 }
  0x33   :  { %11 = sbr.rel (!%p9_p8) target bundleno = 2 (0x2), region = 73 }

</bundles_post_ra>
